<compile_context>
chip_gen: v7x
topology: tpu7x:2x2x1
jax: 0.10.0
libtpu: 0.0.40
codegen_flags: <defaults>
</compile_context>

<pallas_src>
import functools

import jax
import jax.numpy as jnp
from jax import lax
from jax.experimental import pallas as pl
from jax.experimental.pallas import tpu as pltpu


def _round_up(x, m):
    return ((x + m - 1) // m) * m


def _choose_tile(batch, block_rows):
    """Batch tile: multiple of 8, >= 512 rows on large batches (DMA efficiency),
    small enough to give >= 8 grid steps (pipelining + v7x megacore sharding),
    and never larger than the 8-row-aligned batch."""
    block_rows = max(8, _round_up(int(block_rows), 8))
    tb = max(512, _round_up(pl.cdiv(batch, 8), 8))
    tb = min(block_rows, tb, _round_up(batch, 8))
    return max(8, tb)


def generator_kernel(x_ref, w1_ref, b1_ref, w2_ref, b2_ref, w3_ref, b3_ref, o_ref):
    """Batch-on-lanes compute: intermediates are (features, TB) — lane-dense.

    x_ref : (TB, in)   natural row-major tile (f32), cast to MXU dtype in-kernel.
    w*    : (out, in)  PyTorch nn.Linear layout, MXU operand dtype.
    b*    : (out, 1)   f32, broadcast over the lane (batch) axis.
    o_ref : (TB, out)  row-major output tile.
    """
    x = x_ref[...].astype(w1_ref.dtype)  # in-kernel cast: free VPU filler

    # Layer 1: (32, in) x (TB, in)^T -> (32, TB)   ("NT" matmul, f32 accumulation)
    h = lax.dot_general(w1_ref[...], x, (((1,), (1,)), ((), ())),
                        preferred_element_type=jnp.float32)
    h = h + b1_ref[...]
    h = jnp.maximum(h, 0.2 * h)          # LeakyReLU(0.2), lane-dense

    # Layer 2: (64, 32) x (32, TB) -> (64, TB)
    h = jnp.dot(w2_ref[...], h.astype(w2_ref.dtype),
                preferred_element_type=jnp.float32)
    h = h + b2_ref[...]
    h = jnp.maximum(h, 0.2 * h)

    # Layer 3 (no activation): (out, 64) x (64, TB) -> (out, TB)
    o = jnp.dot(w3_ref[...], h.astype(w3_ref.dtype),
                preferred_element_type=jnp.float32)
    o = o + b3_ref[...]

    # Back to the module's row-major (TB, out) layout for the store.
    o_ref[...] = o.T.astype(o_ref.dtype)


@functools.partial(
    jax.jit,
    static_argnames=("block_rows", "compute_dtype", "out_dtype", "vmem_limit_mb"))
def generator_forward(x, params, *, block_rows=16384, compute_dtype=jnp.bfloat16,
                      out_dtype=jnp.float32, vmem_limit_mb=64):
    """Forward pass.

    compute_dtype: MXU operand dtype (bf16 halves x's HBM read for this
        memory-bound kernel; accumulation / bias / LeakyReLU stay f32).
    out_dtype: output dtype (bf16 halves output HBM traffic; f32 matches PyTorch).
    block_rows: batch tile upper bound.  ~0.8 KB of VMEM per row; keep <= ~32K on
        v7x (64 MiB physical VMEM), larger is fine on v5e/v6e if vmem_limit_mb is
        raised accordingly.
    """
    w1, b1, w2, b2, w3, b3 = params      # PyTorch layout: w (out, in), b (out,)
    B, in_dim = x.shape
    out_dim = w3.shape[0]

    # Tiny parameter prep (a few KiB total): MXU operands in compute_dtype,
    # biases f32 shaped (out, 1) so they broadcast over the lane (batch) axis.
    # x itself is passed untouched: no wrapper-side cast / pad / slice passes.
    w1c, w2c, w3c = (w.astype(compute_dtype) for w in (w1, w2, w3))
    b1f, b2f, b3f = (b.reshape(-1, 1).astype(jnp.float32) for b in (b1, b2, b3))

    TB = _choose_tile(B, block_rows)
    grid = (pl.cdiv(B, TB),)             # tail block handled by Pallas masking

    const = lambda i: (0, 0)             # weights/biases: DMA'd once, VMEM-resident

    return pl.pallas_call(
        generator_kernel,
        out_shape=jax.ShapeDtypeStruct((B, out_dim), out_dtype),
        grid=grid,
        in_specs=[
            pl.BlockSpec((TB, in_dim), lambda i: (i, 0)),   # x: tiled over batch
            pl.BlockSpec(w1c.shape, const),
            pl.BlockSpec(b1f.shape, const),
            pl.BlockSpec(w2c.shape, const),
            pl.BlockSpec(b2f.shape, const),
            pl.BlockSpec(w3c.shape, const),
            pl.BlockSpec(b3f.shape, const),
        ],
        out_specs=pl.BlockSpec((TB, out_dim), lambda i: (i, 0)),
        compiler_params=pltpu.CompilerParams(
            dimension_semantics=("parallel",),              # megacore sharding (v7x)
            vmem_limit_bytes=vmem_limit_mb * 1024 * 1024,
        ),
    )(x, w1c, b1f, w2c, b2f, w3c, b3f)


def init_params(key, input_dim, output_dim):
    """PyTorch-style init and layout: w (out_features, in_features), b (out_features,)."""
    dims = [(input_dim, 32), (32, 64), (64, output_dim)]
    params = []
    for fan_in, fan_out in dims:
        key, kw, kb = jax.random.split(key, 3)
        bound = fan_in ** -0.5
        w = jax.random.uniform(kw, (fan_out, fan_in), jnp.float32, -bound, bound)
        b = jax.random.uniform(kb, (fan_out,), jnp.float32, -bound, bound)
        params += [w, b]
    return tuple(params)


def reference_forward(x, params):
    w1, b1, w2, b2, w3, b3 = params
    h = x @ w1.T + b1
    h = jnp.where(h > 0, h, 0.2 * h)
    h = h @ w2.T + b2
    h = jnp.where(h > 0, h, 0.2 * h)
    return h @ w3.T + b3


if __name__ == "__main__":
    key = jax.random.PRNGKey(0)
    input_dim, output_dim, batch = 16, 8, 8

    kx, kp, kx2 = jax.random.split(key, 3)
    x = jax.random.normal(kx, (batch, input_dim), jnp.float32)
    params = init_params(kp, input_dim, output_dim)
    ref = reference_forward(x, params)

    # 1) Exact-dtype path (f32 MXU operands, f32 out) -> tight match vs f32 reference.
    out_f32 = jax.block_until_ready(
        generator_forward(x, params, compute_dtype=jnp.float32))
    assert out_f32.shape == (batch, output_dim)
    assert jnp.allclose(out_f32, ref, atol=1e-4, rtol=1e-4)

    # 2) Perf path (bf16 MXU operands, f32 accumulation) -> loose tolerance vs f32 ref.
    out_bf16 = jax.block_until_ready(
        generator_forward(x, params, compute_dtype=jnp.bfloat16))
    assert jnp.allclose(out_bf16, ref, atol=5e-2, rtol=5e-2)

    # 3) Multi-tile grid + masked tail block (600 rows, 256-row tiles -> 3 steps).
    x2 = jax.random.normal(kx2, (600, input_dim), jnp.float32)
    ref2 = reference_forward(x2, params)
    out2 = jax.block_until_ready(
        generator_forward(x2, params, block_rows=256, compute_dtype=jnp.float32))
    assert out2.shape == (600, output_dim)
    assert jnp.allclose(out2, ref2, atol=1e-4, rtol=1e-4)

    # 4) bf16 output option (halves output HBM traffic) -> documented precision trade-off.
    out_bf16o = jax.block_until_ready(
        generator_forward(x2, params, block_rows=256, compute_dtype=jnp.bfloat16,
                          out_dtype=jnp.bfloat16))
    assert out_bf16o.dtype == jnp.bfloat16
    assert jnp.allclose(out_bf16o.astype(jnp.float32), ref2, atol=1e-1, rtol=1e-1)

    print("KERNEL_OK")
</pallas_src>

<mosaic_0001>
module attributes {stable_mosaic.version = 11 : i64} {
  func.func @generator_kernel(%arg0: i32, %arg1: memref<8x16xf32, #tpu.memory_space<vmem>>, %arg2: memref<32x16xf32, #tpu.memory_space<vmem>>, %arg3: memref<32x1xf32, #tpu.memory_space<vmem>>, %arg4: memref<64x32xf32, #tpu.memory_space<vmem>>, %arg5: memref<64x1xf32, #tpu.memory_space<vmem>>, %arg6: memref<8x64xf32, #tpu.memory_space<vmem>>, %arg7: memref<8x1xf32, #tpu.memory_space<vmem>>, %arg8: memref<8x8xf32, #tpu.memory_space<vmem>>) attributes {dimension_semantics = [#tpu.dimension_semantics<parallel>], iteration_bounds = array<i64: 1>, scalar_prefetch = 0 : i64, scratch_operands = 0 : i64, tpu.core_type = #tpu.core_type<tc>, window_params = [{transform_indices = @transform_0, window_bounds = array<i64: 8, 16>}, {pipeline_mode = #tpu.pipeline_mode<synchronous>, transform_indices = @transform_1, window_bounds = array<i64: 32, 16>}, {pipeline_mode = #tpu.pipeline_mode<synchronous>, transform_indices = @transform_2, window_bounds = array<i64: 32, 1>}, {pipeline_mode = #tpu.pipeline_mode<synchronous>, transform_indices = @transform_3, window_bounds = array<i64: 64, 32>}, {pipeline_mode = #tpu.pipeline_mode<synchronous>, transform_indices = @transform_4, window_bounds = array<i64: 64, 1>}, {pipeline_mode = #tpu.pipeline_mode<synchronous>, transform_indices = @transform_5, window_bounds = array<i64: 8, 64>}, {pipeline_mode = #tpu.pipeline_mode<synchronous>, transform_indices = @transform_6, window_bounds = array<i64: 8, 1>}, {transform_indices = @transform_7, window_bounds = array<i64: 8, 8>}]} {
    %c0 = arith.constant 0 : index
    %c0_0 = arith.constant 0 : index
    %0 = vector.load %arg1[%c0, %c0_0] : memref<8x16xf32, #tpu.memory_space<vmem>>, vector<8x16xf32>
    %c0_1 = arith.constant 0 : index
    %c0_2 = arith.constant 0 : index
    %1 = vector.load %arg2[%c0_1, %c0_2] : memref<32x16xf32, #tpu.memory_space<vmem>>, vector<32x16xf32>
    %cst = arith.constant dense<0.000000e+00> : vector<32x8xf32>
    %2 = tpu.matmul %1, %0, %cst {dimension_numbers = #tpu.dot_dimension_numbers<[1], [1], [0], [0], [0, 0, 1, 0], [], []>} : vector<32x16xf32>, vector<8x16xf32>, vector<32x8xf32> -> vector<32x8xf32>
    %c0_3 = arith.constant 0 : index
    %c0_4 = arith.constant 0 : index
    %3 = vector.load %arg3[%c0_3, %c0_4] : memref<32x1xf32, #tpu.memory_space<vmem>>, vector<32x1xf32>
    %4 = vector.broadcast %3 : vector<32x1xf32> to vector<32x8xf32>
    %5 = arith.addf %2, %4 : vector<32x8xf32>
    %cst_5 = arith.constant 2.000000e-01 : f32
    %6 = vector.broadcast %cst_5 : f32 to vector<32x8xf32>
    %7 = arith.mulf %6, %5 : vector<32x8xf32>
    %8 = arith.maximumf %5, %7 : vector<32x8xf32>
    %c0_6 = arith.constant 0 : index
    %c0_7 = arith.constant 0 : index
    %9 = vector.load %arg4[%c0_6, %c0_7] : memref<64x32xf32, #tpu.memory_space<vmem>>, vector<64x32xf32>
    %cst_8 = arith.constant dense<0.000000e+00> : vector<64x8xf32>
    %10 = tpu.matmul %9, %8, %cst_8 {dimension_numbers = #tpu.dot_dimension_numbers<[1], [0], [0], [1], [0, 0, 1, 1], [], []>} : vector<64x32xf32>, vector<32x8xf32>, vector<64x8xf32> -> vector<64x8xf32>
    %c0_9 = arith.constant 0 : index
    %c0_10 = arith.constant 0 : index
    %11 = vector.load %arg5[%c0_9, %c0_10] : memref<64x1xf32, #tpu.memory_space<vmem>>, vector<64x1xf32>
    %12 = vector.broadcast %11 : vector<64x1xf32> to vector<64x8xf32>
    %13 = arith.addf %10, %12 : vector<64x8xf32>
    %cst_11 = arith.constant 2.000000e-01 : f32
    %14 = vector.broadcast %cst_11 : f32 to vector<64x8xf32>
    %15 = arith.mulf %14, %13 : vector<64x8xf32>
    %16 = arith.maximumf %13, %15 : vector<64x8xf32>
    %c0_12 = arith.constant 0 : index
    %c0_13 = arith.constant 0 : index
    %17 = vector.load %arg6[%c0_12, %c0_13] : memref<8x64xf32, #tpu.memory_space<vmem>>, vector<8x64xf32>
    %cst_14 = arith.constant dense<0.000000e+00> : vector<8x8xf32>
    %18 = tpu.matmul %17, %16, %cst_14 {dimension_numbers = #tpu.dot_dimension_numbers<[1], [0], [0], [1], [0, 0, 1, 1], [], []>} : vector<8x64xf32>, vector<64x8xf32>, vector<8x8xf32> -> vector<8x8xf32>
    %c0_15 = arith.constant 0 : index
    %c0_16 = arith.constant 0 : index
    %19 = vector.load %arg7[%c0_15, %c0_16] : memref<8x1xf32, #tpu.memory_space<vmem>>, vector<8x1xf32>
    %20 = vector.broadcast %19 : vector<8x1xf32> to vector<8x8xf32>
    %21 = arith.addf %18, %20 : vector<8x8xf32>
    %22 = tpu.transpose %21, [1, 0] : vector<8x8xf32> -> vector<8x8xf32>
    %c0_17 = arith.constant 0 : index
    %c0_18 = arith.constant 0 : index
    %23 = vector.load %arg8[%c0_17, %c0_18] : memref<8x8xf32, #tpu.memory_space<vmem>>, vector<8x8xf32>
    tpu.vector_store %arg8[%c0_17, %c0_18], %22 {strides = array<i32>} : memref<8x8xf32, #tpu.memory_space<vmem>>, vector<8x8xf32>,
    return
  }
  func.func @transform_0(%arg0: i32) -> (i32, i32) {
    %c0_i32 = arith.constant 0 : i32
    %c0_i32_0 = arith.constant 0 : i32
    return %arg0, %c0_i32 : i32, i32
  }
  func.func @transform_1(%arg0: i32) -> (i32, i32) {
    %c0_i32 = arith.constant 0 : i32
    %c0_i32_0 = arith.constant 0 : i32
    %c0_i32_1 = arith.constant 0 : i32
    return %c0_i32, %c0_i32_0 : i32, i32
  }
  func.func @transform_2(%arg0: i32) -> (i32, i32) {
    %c0_i32 = arith.constant 0 : i32
    %c0_i32_0 = arith.constant 0 : i32
    %c0_i32_1 = arith.constant 0 : i32
    return %c0_i32, %c0_i32_0 : i32, i32
  }
  func.func @transform_3(%arg0: i32) -> (i32, i32) {
    %c0_i32 = arith.constant 0 : i32
    %c0_i32_0 = arith.constant 0 : i32
    %c0_i32_1 = arith.constant 0 : i32
    return %c0_i32, %c0_i32_0 : i32, i32
  }
  func.func @transform_4(%arg0: i32) -> (i32, i32) {
    %c0_i32 = arith.constant 0 : i32
    %c0_i32_0 = arith.constant 0 : i32
    %c0_i32_1 = arith.constant 0 : i32
    return %c0_i32, %c0_i32_0 : i32, i32
  }
  func.func @transform_5(%arg0: i32) -> (i32, i32) {
    %c0_i32 = arith.constant 0 : i32
    %c0_i32_0 = arith.constant 0 : i32
    %c0_i32_1 = arith.constant 0 : i32
    return %c0_i32, %c0_i32_0 : i32, i32
  }
  func.func @transform_6(%arg0: i32) -> (i32, i32) {
    %c0_i32 = arith.constant 0 : i32
    %c0_i32_0 = arith.constant 0 : i32
    %c0_i32_1 = arith.constant 0 : i32
    return %c0_i32, %c0_i32_0 : i32, i32
  }
  func.func @transform_7(%arg0: i32) -> (i32, i32) {
    %c0_i32 = arith.constant 0 : i32
    %c0_i32_0 = arith.constant 0 : i32
    return %arg0, %c0_i32 : i32, i32
  }
}

</mosaic_0001>

<bundles_post_ra>
// kernel: generator_forward.1
= control target key start
LH: loop header
LB: loop body
LE: loop exit
PB: predicated region body
PF: predicated region fallthrough
CT: control target
= control target key end

     0   :  { %12 = vsyncpa [#allocation3], 0  ;;  %s1074_s0 = inlined_call_operand.hbm [shape: f32[8,16], index: 0, kind: input, shape index: {}]   ;;  %s1075_s1 = inlined_call_operand.hbm [shape: f32[32,16], index: 1, kind: input, shape index: {}]   ;;  %s1076_s2 = inlined_call_operand.hbm [shape: f32[32,1], index: 2, kind: input, shape index: {}]   ;;  %s1077_s3 = inlined_call_operand.hbm [shape: f32[64,32], index: 3, kind: input, shape index: {}]   ;;  %s1078_s4 = inlined_call_operand.hbm [shape: f32[64,1], index: 4, kind: input, shape index: {}]   ;;  %s1079_s5 = inlined_call_operand.hbm [shape: f32[8,64], index: 5, kind: input, shape index: {}]   ;;  %s1080_s6 = inlined_call_operand.hbm [shape: f32[8,1], index: 6, kind: input, shape index: {}]   ;;  %s1081_s7 = inlined_call_operand.hbm [shape: f32[8,8], index: 7, kind: output, shape index: {}]  }
   0x1   :  { %13 = vsyncpa [#allocation6], 0 }
   0x2   :  { %14 = vsyncpa [#allocation9], 0 }
   0x3   :  { %15 = vsyncpa [#allocation12], 0 }
   0x4   :  { %16 = vsyncpa [#allocation4], 0  ;;  %s898_s24 = smov [#allocation5]   ;;  %s712_s28 = scalar_lea.hbm %s1075_s1, 512 }
   0x5   :  { %s32_s25 = sshll.u32 %s898_s24, 4  ;;  %p713_p0 = scmp.ne.s32.totalorder %s1075_s1, %s712_s28  ;;  %s33_s25 = int_to_ptr.vmem [resolvable:$true] %s32_s25 }
   0x6   :  { %p716_p1 = scmp.lt.u32.totalorder %s712_s28, %s1075_s1 }
   0x8   :  { %p718_p2 = pnand %p716_p1, %p713_p0 }
   0xa   :  { %721 = shalt.err (!%p718_p2)
}
   0xb   :  { %s722_s10 = scalar_lea.vmem %s33_s25, 512  ;;  %p727_p4 = scmp.lt.s32.totalorder %s33_s25, %s33_s25 }
   0xc   :  { %p723_p3 = scmp.ne.s32.totalorder %s33_s25, %s722_s10  ;;  %p728_p5 = scmp.lt.s32.totalorder %s722_s10, %s722_s10 }
   0xe   :  { %p729_p6 = por %p728_p5, %p727_p4 }
  0x10   :  { %p730_p7 = pnand %p729_p6, %p723_p3 }
  0x12   :  { %733 = shalt.err (!%p730_p7)
}
  0x13   :  { %s899_s11 = smov 128   ;;  %s900_s12 = smov 8  }
  0x14   :  { %38 = dma.hbm_to_vmem [thread:$0]  %s1075_s1, 512, %s33_s25, [#allocation6], %s899_s11, %s899_s11, %s900_s12  }
  0x15   :  { %s901_s15 = smov [#allocation8]   ;;  %s902_s17 = smov [#allocation11]  }
  0x16   :  { %s56_s16 = sshll.u32 %s901_s15, 4  ;;  %s81_s18 = sshll.u32 %s902_s17, 4  ;;  %s57_s16 = int_to_ptr.vmem [resolvable:$true] %s56_s16  ;;  %s82_s18 = int_to_ptr.vmem [resolvable:$true] %s81_s18 }
  0x17   :  { %s734_s21 = scalar_lea.hbm %s1077_s3, 1024 }
  0x18   :  { %p735_p8 = scmp.ne.s32.totalorder %s1077_s3, %s734_s21  ;;  %p738_p9 = scmp.lt.u32.totalorder %s734_s21, %s1077_s3 }
  0x1a   :  { %p740_p10 = pnand %p738_p9, %p735_p8 }
  0x1c   :  { %743 = shalt.err (!%p740_p10)
}
  0x1d   :  { %s744_s1 = scalar_lea.vmem %s57_s16, 1024  ;;  %p749_p12 = scmp.lt.s32.totalorder %s57_s16, %s57_s16 }
  0x1e   :  { %p745_p11 = scmp.ne.s32.totalorder %s57_s16, %s744_s1  ;;  %p750_p13 = scmp.lt.s32.totalorder %s744_s1, %s744_s1 }
  0x20   :  { %p751_p0 = por %p750_p13, %p749_p12 }
  0x22   :  { %p752_p1 = pnand %p751_p0, %p745_p11 }
  0x24   :  { %755 = shalt.err (!%p752_p1)
}
  0x25   :  { %62 = dma.hbm_to_vmem [thread:$0]  %s1077_s3, 1024, %s57_s16, [#allocation9], %s899_s11, %s899_s11, %s900_s12  }
  0x26   :  { %s756_s30 = scalar_lea.hbm %s1079_s5, 128 }
  0x27   :  { %p757_p2 = scmp.ne.s32.totalorder %s1079_s5, %s756_s30  ;;  %p760_p3 = scmp.lt.u32.totalorder %s756_s30, %s1079_s5 }
  0x29   :  { %p762_p4 = pnand %p760_p3, %p757_p2 }
  0x2b   :  { %765 = shalt.err (!%p762_p4)
}
  0x2c   :  { %s766_s14 = scalar_lea.vmem %s82_s18, 128  ;;  %p771_p6 = scmp.lt.s32.totalorder %s82_s18, %s82_s18 }
  0x2d   :  { %p767_p5 = scmp.ne.s32.totalorder %s82_s18, %s766_s14  ;;  %p772_p7 = scmp.lt.s32.totalorder %s766_s14, %s766_s14 }
  0x2f   :  { %p773_p8 = por %p772_p7, %p771_p6 }
  0x31   :  { %p774_p9 = pnand %p773_p8, %p767_p5 }
  0x33   :  { %777 = shalt.err (!%p774_p9)
}
  0x34   :  { %84 = dma.hbm_to_vmem [thread:$0]  %s1079_s5, 128, %s82_s18, [#allocation12]  }
  0x35   :  { %s903_s16 = smov [#allocation2]   ;;  %s904_s19 = smov [#allocation7]  }
  0x36   :  { %s23_s17 = sshll.u32 %s903_s16, 4  ;;  %s44_s20 = sshll.u32 %s904_s19, 4  ;;  %s24_s17 = int_to_ptr.vmem [resolvable:$true] %s23_s17  ;;  %s45_s20 = int_to_ptr.vmem [resolvable:$true] %s44_s20 }
  0x37   :  { %s778_s23 = scalar_lea.hbm %s1074_s0, 128 }
  0x38   :  { %p779_p10 = scmp.ne.s32.totalorder %s1074_s0, %s778_s23  ;;  %p782_p11 = scmp.lt.u32.totalorder %s778_s23, %s1074_s0 }
  0x3a   :  { %p784_p12 = pnand %p782_p11, %p779_p10 }
  0x3c   :  { %787 = shalt.err (!%p784_p12)
}
  0x3d   :  { %s788_s5 = scalar_lea.vmem %s24_s17, 128  ;;  %p793_p0 = scmp.lt.s32.totalorder %s24_s17, %s24_s17 }
  0x3e   :  { %p789_p13 = scmp.ne.s32.totalorder %s24_s17, %s788_s5  ;;  %p794_p1 = scmp.lt.s32.totalorder %s788_s5, %s788_s5 }
  0x40   :  { %p795_p2 = por %p794_p1, %p793_p0 }
  0x42   :  { %p796_p3 = pnand %p795_p2, %p789_p13 }
  0x44   :  { %799 = shalt.err (!%p796_p3)
}
  0x45   :  { %26 = dma.hbm_to_vmem [thread:$0]  %s1074_s0, 128, %s24_s17, [#allocation3]  }
  0x46   :  { %s800_s30 = scalar_lea.hbm %s1076_s2, 512 }
  0x47   :  { %p801_p4 = scmp.ne.s32.totalorder %s1076_s2, %s800_s30  ;;  %p804_p5 = scmp.lt.u32.totalorder %s800_s30, %s1076_s2 }
  0x49   :  { %p806_p6 = pnand %p804_p5, %p801_p4 }
  0x4b   :  { %809 = shalt.err (!%p806_p6)
}
  0x4c   :  { %s810_s14 = scalar_lea.vmem %s45_s20, 512  ;;  %p815_p8 = scmp.lt.s32.totalorder %s45_s20, %s45_s20 }
  0x4d   :  { %p811_p7 = scmp.ne.s32.totalorder %s45_s20, %s810_s14  ;;  %p816_p9 = scmp.lt.s32.totalorder %s810_s14, %s810_s14 }
  0x4f   :  { %p817_p10 = por %p816_p9, %p815_p8 }
  0x51   :  { %p818_p11 = pnand %p817_p10, %p811_p7 }
  0x53   :  { %821 = shalt.err (!%p818_p11)
}
  0x54   :  { %50 = dma.hbm_to_vmem [thread:$0]  %s1076_s2, 512, %s45_s20, [#allocation6], %s899_s11, %s899_s11, %s900_s12  }
  0x55   :  { %s905_s15 = smov [#allocation10]   ;;  %s906_s17 = smov [#allocation13]  }
  0x56   :  { %s68_s16 = sshll.u32 %s905_s15, 4  ;;  %s91_s19 = sshll.u32 %s906_s17, 4  ;;  %s69_s16 = int_to_ptr.vmem [resolvable:$true] %s68_s16  ;;  %s92_s19 = int_to_ptr.vmem [resolvable:$true] %s91_s19 }
  0x57   :  { %s822_s23 = scalar_lea.hbm %s1078_s4, 1024 }
  0x58   :  { %p823_p12 = scmp.ne.s32.totalorder %s1078_s4, %s822_s23  ;;  %p826_p13 = scmp.lt.u32.totalorder %s822_s23, %s1078_s4 }
  0x5a   :  { %p828_p0 = pnand %p826_p13, %p823_p12 }
  0x5c   :  { %831 = shalt.err (!%p828_p0)
}
  0x5d   :  { %s832_s2 = scalar_lea.vmem %s69_s16, 1024  ;;  %p837_p2 = scmp.lt.s32.totalorder %s69_s16, %s69_s16 }
  0x5e   :  { %p833_p1 = scmp.ne.s32.totalorder %s69_s16, %s832_s2  ;;  %p838_p3 = scmp.lt.s32.totalorder %s832_s2, %s832_s2 }
  0x60   :  { %p839_p4 = por %p838_p3, %p837_p2 }
  0x62   :  { %p840_p5 = pnand %p839_p4, %p833_p1 }
  0x64   :  { %843 = shalt.err (!%p840_p5)
}
  0x65   :  { %74 = dma.hbm_to_vmem [thread:$0]  %s1078_s4, 1024, %s69_s16, [#allocation9], %s899_s11, %s899_s11, %s900_s12  }
  0x66   :  { %s844_s28 = scalar_lea.hbm %s1080_s6, 128 }
  0x67   :  { %p845_p6 = scmp.ne.s32.totalorder %s1080_s6, %s844_s28  ;;  %p848_p7 = scmp.lt.u32.totalorder %s844_s28, %s1080_s6 }
  0x69   :  { %p850_p8 = pnand %p848_p7, %p845_p6 }
  0x6b   :  { %853 = shalt.err (!%p850_p8)
}
  0x6c   :  { %s854_s10 = scalar_lea.vmem %s92_s19, 128  ;;  %p859_p10 = scmp.lt.s32.totalorder %s92_s19, %s92_s19 }
  0x6d   :  { %p855_p9 = scmp.ne.s32.totalorder %s92_s19, %s854_s10  ;;  %p860_p11 = scmp.lt.s32.totalorder %s854_s10, %s854_s10 }
  0x6f   :  { %p861_p12 = por %p860_p11, %p859_p10 }
  0x71   :  { %p862_p13 = pnand %p861_p12, %p855_p9 }
  0x73   :  { %865 = shalt.err (!%p862_p13)
}
  0x74   :  { %94 = dma.hbm_to_vmem [thread:$0]  %s1080_s6, 128, %s92_s19, [#allocation12]  }
  0x75   :  { %888 = dma.done.wait [#allocation3], 128  }
  0x76   :  { %889 = vsyncadd [#allocation3], 4294967168 }
  0x77   :  { %890 = dma.done.wait [#allocation6], 1024  }
  0x78   :  { %891 = vsyncadd [#allocation6], 4294966272 }
  0x79   :  { %892 = dma.done.wait [#allocation9], 2048  }
  0x7a   :  { %893 = vsyncadd [#allocation9], 4294965248 }
  0x7b   :  { %894 = dma.done.wait [#allocation12], 256  }
  0x7c   :  { %895 = vsyncadd [#allocation12], 4294967040  ;;  %v907_v0 = vmov 0   ;;  %vm145_vm0 = vcmask 130048   ;;  %v116_v1 = vld [vmem:[#allocation2] sm:$0xff]  ;;  %v117_v2 = vld [vmem:[#allocation5] sm:$0xff] }
  0x7d   :  { %710 = vset.pattern.permute.xlu0 %v907_v0  ;;  %711 = vset.pattern.permute.xlu1 %v907_v0  ;;  %v121_v3 = vld [vmem:[#allocation7] sm:$0xff]  ;;  %v118_v4 = vld [vmem:[#allocation5 + $0x8] sm:$0xff]  ;;  %v123_v5 = vld [vmem:[#allocation7 + $0x10] sm:$0xff]  ;;  %vm310_vm1 = vcmask 261120   ;;  %v908_v49 = vmov 0.0|0.0   ;;  %vm909_vm2 = vmmov 0  }
  0x7e   :  { %629 = vmatprep.subr.msk.mxu0 %vm145_vm0, %v116_v1  ;;  %631 = vmatprep.mubr.msk.f32.mxu0 %vm145_vm0, %v117_v2  ;;  %v119_v6 = vld [vmem:[#allocation5 + $0x10] sm:$0xff]  ;;  %v122_v7 = vld [vmem:[#allocation7 + $0x8] sm:$0xff]  ;;  %v124_v8 = vld [vmem:[#allocation7 + $0x18] sm:$0xff]  ;;  %v910_v50 = vmov 0.0   ;;  %vm463_vm3 = vcmask 523264   ;;  %s911_s6 = smov [#allocation14]  }
  0x7f   :  { %630 = vmatpush3.xpose.msk.msra.mxu0 %vm145_vm0, %v116_v1  ;;  %127 = vperm.xlu0 %710, %v121_v3   ;;  %v120_v9 = vld [vmem:[#allocation5 + $0x18] sm:$0xff]  ;;  %v262_v10 = vld [vmem:[#allocation10] sm:$0xff]  ;;  %v263_v11 = vld [vmem:[#allocation10 + $0x8] sm:$0xff]  ;;  %s577_s12 = sshll.u32 %s911_s6, 4  ;;  %vm569_vm4 = vcmask 64512   ;;  %s578_s12 = int_to_ptr.vmem [resolvable:$true] %s577_s12 }
  0x80   :  { %137 = vperm.xlu1 %711, %v123_v5   ;;  %v264_v12 = vld [vmem:[#allocation10 + $0x10] sm:$0xff]  ;;  %v265_v13 = vld [vmem:[#allocation10 + $0x18] sm:$0xff]  ;;  %v266_v14 = vld [vmem:[#allocation10 + $0x20] sm:$0xff]  ;;  %684 = vmatprep.subr.bf16.mxu0 %v908_v49  ;;  %s866_s13 = scalar_lea.vmem %s578_s12, 128  ;;  %p871_p1 = scmp.lt.s32.totalorder %s578_s12, %s578_s12 }
  0x81   :  { %v267_v15 = vld [vmem:[#allocation10 + $0x28] sm:$0xff]  ;;  %v268_v16 = vld [vmem:[#allocation10 + $0x30] sm:$0xff]  ;;  %v269_v17 = vld [vmem:[#allocation10 + $0x38] sm:$0xff]  ;;  %p867_p0 = scmp.ne.s32.totalorder %s578_s12, %s866_s13  ;;  %p872_p2 = scmp.lt.s32.totalorder %s866_s13, %s866_s13 }
  0x82   :  { %632 = vmatmul.mubr.msk.f32.vlgmr.msra.gmra.mrb[0].mxu0 %vm145_vm0, %v118_v4  ;;  %v457_v18 = vld [vmem:[#allocation13] sm:$0xff]  ;;  %v254_v19 = vld [vmem:[#allocation8] sm:$0xff]  ;;  %v256_v43 = vld [vmem:[#allocation8 + $0x10] sm:$0xff] }
  0x83   :  { %634 = vmatprep.mubr.msk.f32.mxu0 %vm145_vm0, %v119_v6  ;;  %132 = vperm.xlu0 %710, %v122_v7   ;;  %v255_v42 = vld [vmem:[#allocation8 + $0x8] sm:$0xff]  ;;  %v257_v44 = vld [vmem:[#allocation8 + $0x18] sm:$0xff]  ;;  %v258_v45 = vld [vmem:[#allocation8 + $0x20] sm:$0xff]  ;;  %p873_p3 = por %p872_p2, %p871_p1 }
  0x84   :  { %142 = vperm.xlu1 %711, %v124_v8   ;;  %645 = vmatprep.mubr.msk.f32.mxu1 %vm310_vm1, %v254_v19  ;;  %v259_v46 = vld [vmem:[#allocation8 + $0x28] sm:$0xff]  ;;  %v260_v47 = vld [vmem:[#allocation8 + $0x30] sm:$0xff]  ;;  %v261_v48 = vld [vmem:[#allocation8 + $0x38] sm:$0xff] }
  0x85   :  { %p874_p4 = pnand %p873_p3, %p867_p0 }
  0x86   :  { %635 = vmatmul.mubr.msk.f32.gmra.mrb[2].mxu0 %vm145_vm0, %v120_v9 }
  0x87   :  { %272 = vperm.xlu0 %710, %v262_v10   ;;  %673 = vmatprep.mubr.msk.f32.mxu0 %vm909_vm2, %v910_v50 }
  0x88   :  { %277 = vperm.xlu1 %711, %v263_v11  }
  0x8b   :  { %282 = vperm.xlu0 %710, %v264_v12  }
  0x8c   :  { %287 = vperm.xlu1 %711, %v265_v13  }
  0x8f   :  { %292 = vperm.xlu0 %710, %v266_v14  }
  0x90   :  { %297 = vperm.xlu1 %711, %v267_v15  }
  0x93   :  { %302 = vperm.xlu0 %710, %v268_v16  }
  0x94   :  { %307 = vperm.xlu1 %711, %v269_v17  }
  0x97   :  { %460 = vperm.xlu0 %710, %v457_v18  }
  0xfe   :  { %v128_v20 = vpop.permute.xlu0 %127 }
  0xff   :  { %v138_v21 = vpop.permute.xlu1 %137 }
 0x102   :  { %v133_v22 = vpop.permute.xlu0 %132 }
 0x103   :  { %v143_v28 = vpop.permute.xlu1 %142 }
 0x106   :  { %v273_v52 = vpop.permute.xlu0 %272 }
 0x107   :  { %v278_v51 = vpop.permute.xlu1 %277 }
 0x10a   :  { %v283_v55 = vpop.permute.xlu0 %282 }
 0x10b   :  { %v288_v53 = vpop.permute.xlu1 %287 }
 0x10e   :  { %v293_v4 = vpop.permute.xlu0 %292 }
 0x10f   :  { %v298_v1 = vpop.permute.xlu1 %297 }
 0x112   :  { %v303_v19 = vpop.permute.xlu0 %302 }
 0x113   :  { %v308_v15 = vpop.permute.xlu1 %307 }
 0x155   :  { %v633_v23 = vpop.f32.mrb[0].mxu0 }
 0x156   :  { %v233_v24 = vadd.f32 %v633_v23, %v133_v22  ;;  %v227_v25 = vpop.f32.mrb[1].mxu0 }
 0x157   :  { %v228_v26 = vadd.f32 %v227_v25, %v128_v20 }
 0x158   :  { %v247_v27 = vmul.f32 0.2, %v233_v24 }
 0x159   :  { %v246_v29 = vmul.f32 0.2, %v228_v26  ;;  %v636_v30 = vpop.f32.mrb[2].mxu0 }
 0x15a   :  { %v251_v31 = vmax.f32 %v233_v24, %v247_v27  ;;  %v243_v32 = vadd.f32 %v636_v30, %v143_v28  ;;  %v237_v33 = vpop.f32.mrb[3].mxu0 }
 0x15b   :  { %v250_v34 = vmax.f32 %v228_v26, %v246_v29  ;;  %v238_v35 = vadd.f32 %v237_v33, %v138_v21 }
 0x15c   :  { %v249_v36 = vmul.f32 0.2, %v243_v32 }
 0x15d   :  { %v248_v37 = vmul.f32 0.2, %v238_v35  ;;  %v676_v38 = vpack.c.bf16 %v251_v31, %v250_v34  ;;  %v456_v31 = vld [vmem:[#allocation11] sm:$0xff] }
 0x15e   :  { %v253_v39 = vmax.f32 %v243_v32, %v249_v36  ;;  %v461_v32 = vpop.permute.xlu0 %460 }
 0x15f   :  { %v252_v40 = vmax.f32 %v238_v35, %v248_v37  ;;  %677 = vmatprep.subr.bf16.mxu1 %v676_v38 }
 0x160   :  { %679 = vmatpush3.bf16.msra.mxu1 %v676_v38 }
 0x161   :  { %v680_v41 = vpack.c.bf16 %v253_v39, %v252_v40 }
 0x163   :  { %681 = vmatprep.subr.bf16.mxu1 %v680_v41 }
 0x164   :  { %683 = vmatpush3.bf16.msra.mxu1 %v680_v41 }
 0x167   :  { %646 = vmatmul.mubr.msk.f32.vlgmr.msra.gmra.mrb[0].mxu1 %vm310_vm1, %v255_v42 }
 0x168   :  { %648 = vmatprep.mubr.msk.f32.mxu1 %vm310_vm1, %v256_v43 }
 0x16b   :  { %649 = vmatmul.mubr.msk.f32.gmra.mrb[2].mxu1 %vm310_vm1, %v257_v44 }
 0x16c   :  { %651 = vmatprep.mubr.msk.f32.mxu1 %vm310_vm1, %v258_v45 }
 0x16f   :  { %652 = vmatmul.mubr.msk.f32.gmra.mrb[4].mxu1 %vm310_vm1, %v259_v46 }
 0x170   :  { %654 = vmatprep.mubr.msk.f32.mxu1 %vm310_vm1, %v260_v47 }
 0x173   :  { %655 = vmatmul.mubr.msk.f32.gmra.mrb[6].mxu1 %vm310_vm1, %v261_v48 }
 0x23a   :  { %v647_v54 = vpop.f32.mrb[0].mxu1 }
 0x23b   :  { %v407_v56 = vadd.f32 %v647_v54, %v278_v51  ;;  %v401_v57 = vpop.f32.mrb[1].mxu1 }
 0x23c   :  { %v402_v58 = vadd.f32 %v401_v57, %v273_v52 }
 0x23d   :  { %v441_v59 = vmul.f32 0.2, %v407_v56 }
 0x23e   :  { %v440_v60 = vmul.f32 0.2, %v402_v58  ;;  %v650_v61 = vpop.f32.mrb[2].mxu1 }
 0x23f   :  { %v449_v62 = vmax.f32 %v407_v56, %v441_v59  ;;  %v417_v63 = vadd.f32 %v650_v61, %v288_v53  ;;  %v411_v0 = vpop.f32.mrb[3].mxu1 }
 0x240   :  { %v448_v2 = vmax.f32 %v402_v58, %v440_v60  ;;  %v412_v3 = vadd.f32 %v411_v0, %v283_v55 }
 0x241   :  { %v443_v5 = vmul.f32 0.2, %v417_v63 }
 0x242   :  { %v685_v6 = vpack.c.bf16 %v449_v62, %v448_v2  ;;  %v442_v7 = vmul.f32 0.2, %v412_v3  ;;  %v653_v8 = vpop.f32.mrb[4].mxu1 }
 0x243   :  { %v451_v9 = vmax.f32 %v417_v63, %v443_v5  ;;  %v427_v10 = vadd.f32 %v653_v8, %v298_v1  ;;  %v421_v11 = vpop.f32.mrb[5].mxu1 }
 0x244   :  { %v450_v12 = vmax.f32 %v412_v3, %v442_v7  ;;  %v422_v13 = vadd.f32 %v421_v11, %v293_v4  ;;  %686 = vmatpush3.bf16.msra.mxu0 %v685_v6 }
 0x245   :  { %v445_v14 = vmul.f32 0.2, %v427_v10  ;;  %687 = vmatprep.subr.bf16.mxu0 %v908_v49 }
 0x246   :  { %v688_v16 = vpack.c.bf16 %v451_v9, %v450_v12  ;;  %v444_v17 = vmul.f32 0.2, %v422_v13  ;;  %v656_v18 = vpop.f32.mrb[6].mxu1 }
 0x247   :  { %v453_v20 = vmax.f32 %v427_v10, %v445_v14  ;;  %v437_v21 = vadd.f32 %v656_v18, %v308_v15  ;;  %v431_v22 = vpop.f32.mrb[7].mxu1 }
 0x248   :  { %v452_v23 = vmax.f32 %v422_v13, %v444_v17  ;;  %v432_v24 = vadd.f32 %v431_v22, %v303_v19  ;;  %689 = vmatpush3.bf16.msra.mxu0 %v688_v16 }
 0x249   :  { %v447_v25 = vmul.f32 0.2, %v437_v21  ;;  %690 = vmatprep.subr.bf16.mxu0 %v908_v49 }
 0x24a   :  { %v691_v26 = vpack.c.bf16 %v453_v20, %v452_v23  ;;  %v446_v27 = vmul.f32 0.2, %v432_v24 }
 0x24b   :  { %v455_v28 = vmax.f32 %v437_v21, %v447_v25 }
 0x24c   :  { %v454_v29 = vmax.f32 %v432_v24, %v446_v27  ;;  %692 = vmatpush3.bf16.msra.mxu0 %v691_v26 }
 0x24d   :  { %693 = vmatprep.subr.bf16.mxu0 %v908_v49 }
 0x24e   :  { %v694_v30 = vpack.c.bf16 %v455_v28, %v454_v29 }
 0x250   :  { %695 = vmatpush3.bf16.msra.mxu0 %v694_v30 }
 0x253   :  { %674 = vmatmul.mubr.msk.f32.vlgmr.msra.gmra.mrb[4].mxu0 %vm463_vm3, %v456_v31 }
 0x326   :  { %v533_v33 = vpop.f32.mrb[4].mxu0 }
 0x327   :  { %v534_v34 = vadd.f32 %v533_v33, %v461_v32  ;;  %v675_v35 = vpop.f32.mrb[5].mxu0 }
 0x329   :  { %537 = vxpose.xlu1.b32.start.end [1/1] (short) (narrow) %v534_v34, 8 }
 0x3a9   :  { %v553_v36 = vpop.trf.xlu1 }
 0x3aa   :  { %570 = vst.msk [vmem:[#allocation14] sm:$0xff] %vm569_vm4, %v553_v36 }
 0x3ab   :  { %877 = shalt.err (!%p874_p4)
}
 0x3ac   :  { %s878_s3 = scalar_lea.hbm %s1081_s7, 128 }
 0x3ad   :  { %p879_p5 = scmp.ne.s32.totalorder %s1081_s7, %s878_s3  ;;  %p882_p6 = scmp.lt.u32.totalorder %s878_s3, %s1081_s7 }
 0x3af   :  { %p884_p7 = pnand %p882_p6, %p879_p5 }
 0x3b1   :  { %887 = shalt.err (!%p884_p7)
}
 0x3b2   :  { %580 = dma.vmem_to_hbm [thread:$0]  %s578_s12, 128, %s1081_s7, [#allocation4]  }
 0x3b3   :  { %896 = dma.done.wait [#allocation4], 128  }
 0x3b4   :  { %897 = vsyncadd [#allocation4], 4294967168 }
 0x3b5   :  { %584 = vsyncpa [#allocation3], 1 }
 0x3b6   :  { %585 = vsyncpa [#allocation6], 1 }
 0x3b7   :  { %586 = vsyncpa [#allocation9], 1 }
 0x3b8   :  { %587 = vsyncpa [#allocation12], 1 }
 0x3b9   :  { %588 = vsyncpa [#allocation4], 1 }

</bundles_post_ra>
